<compile_context>
chip_gen: v7x
topology: tpu7x:2x2x1
jax: 0.10.0
libtpu: 0.0.40
codegen_flags: <defaults>
</compile_context>

<pallas_src>
import functools

import jax
import jax.numpy as jnp
from jax.experimental import pallas as pl
from jax.experimental.pallas import tpu as pltpu


def _leaky(x, slope=0.2):   # module hard-codes nn.LeakyReLU(0.2)
    return jnp.where(x >= 0, x, slope * x)


# ----------------------------------------------------------------------------
# Kernel
# ----------------------------------------------------------------------------
def gat_kernel(atoms_ref, atoms_flat_ref, bonds_ref, wall_ref, ball_ref,
               w2_ref, be2_ref, out_ref, *, bt, n_nodes, n_rel, c_out, c_in):
    Bt, N, R, C = bt, n_nodes, n_rel, c_out
    JN = R * N                         # joint (relation-major) lane axis: q = r*N + j

    # ---- fused projection: one MXU push gives e1 (tiled over j) and h -------
    atoms2 = atoms_ref[...].reshape(Bt * N, c_in)                     # major collapse
    proj = (jnp.dot(atoms2, wall_ref[...], preferred_element_type=jnp.float32)
            + ball_ref[...])                                          # (Bt*N, JN + R*C)
    e1 = proj[:, :JN].reshape(Bt, N, JN)                              # (Bt, N_i, JN)

    # e2 in the same lane packing via the block-diagonal neighbour weight
    # (w2big[j*c_in+k, r*N+j'] = wa2[k,r]*[j==j']), directly lane-dense.
    af = atoms_flat_ref[...].reshape(Bt, N * c_in)                    # (Bt, N*c_in)
    e2 = (jnp.dot(af, w2_ref[...], preferred_element_type=jnp.float32)
          + be2_ref[...])                                             # (Bt, JN)

    raw = _leaky(e1 + e2[:, None, :])                                 # (Bt, N_i, JN)

    # ---- joint masked softmax over the lane axis -----------------------------
    # bonds is 0/1 one-hot, so bonds * exp(raw - m) equals the -9e15-masked
    # softmax numerator exactly.  (Self-connections guarantee every query row
    # has at least one bond; a fully unbonded row — impossible under the module
    # contract — would give 0/0 here vs. uniform in torch.)
    bonds = bonds_ref[...].astype(jnp.float32)                        # int8 -> f32
    m = jnp.max(raw, axis=2, keepdims=True)
    p = bonds * jnp.exp(raw - m)
    s = jnp.sum(p, axis=2, keepdims=True)
    probs = p * pl.reciprocal(s, approx=True)                         # (Bt, N_i, JN)

    # ---- aggregation: R contiguous-lane-slice batched matmuls (bf16 MXU) ----
    probs_b = probs.astype(jnp.bfloat16)
    h_all = proj[:, JN:].astype(jnp.bfloat16)                         # (Bt*N, R*C)
    acc = jnp.zeros((Bt, N, C), jnp.float32)
    for r in range(R):                                                # static unroll, R tiny
        p_r = probs_b[:, :, r * N:(r + 1) * N]                        # (Bt, N_i, N_j)
        h_r = h_all[:, r * C:(r + 1) * C].reshape(Bt, N, C)           # (Bt, N_j, C)
        acc = acc + jnp.einsum("bij,bjc->bic", p_r, h_r,
                               preferred_element_type=jnp.float32)
    # TODO(synk): if the bundle dump shows masked vst on the critical path,
    # emit a lane-dense (Bt, N*C) output slab instead of (Bt, N, C).
    out_ref[...] = acc.astype(out_ref.dtype)


# ----------------------------------------------------------------------------
# Batch-block sizing (padded VMEM footprint, enough grid steps to pipeline)
# ----------------------------------------------------------------------------
def _round_up(x, m):
    return (x + m - 1) // m * m


def _pick_batch_block(batch, n, r, c_in, c_out,
                      vmem_budget_bytes=28 << 20, min_steps=4):
    jn, rc = r * n, r * c_out
    pad_n = _round_up(n, 8)
    # Bytes that scale per batch element, with trailing dims padded to (8,128);
    # x2 on the pallas_call blocks accounts for double buffering.
    per = 0
    per += 2 * pad_n * _round_up(c_in, 128) * 4          # atoms block
    per += 2 * pad_n * _round_up(jn, 128) * 1            # bonds block (int8)
    per += 2 * pad_n * _round_up(c_out, 128) * 4         # output block
    per += pad_n * _round_up(jn + rc, 128) * 4           # proj
    per += 3 * pad_n * _round_up(jn, 128) * 4            # raw / p / probs
    per += 2 * pad_n * _round_up(jn, 128) * 2            # bf16 probs + h copies
    per += pad_n * _round_up(c_out, 128) * 4             # acc
    fixed = 2 * 4 * (_round_up(c_in, 8) * _round_up(jn + rc, 128)
                     + _round_up(n * c_in, 8) * _round_up(jn, 128)
                     + 8 * _round_up(n * c_in, 128)
                     + 2 * 8 * _round_up(jn + rc, 128))  # weights/biases/atoms_flat
    budget = max(vmem_budget_bytes - fixed, per)
    bt = max(1, min(batch, budget // per))
    # Keep >= min_steps grid steps so the bonds DMA pipelines behind compute
    # and (on v7x) the "parallel" batch axis spans both TensorCores.
    if batch >= min_steps:
        bt = min(bt, batch // min_steps)
    elif batch >= 2:
        bt = min(bt, batch // 2)
    bt = max(1, int(bt))
    while batch % bt:
        bt -= 1
    return bt


# ----------------------------------------------------------------------------
# Wrapper
# ----------------------------------------------------------------------------
def gat_layer(atoms, bonds, w, b, a, *, batch_block=None):
    """GATLayer forward.

    atoms: (B, N, c_in)  one-hot node features
    bonds: (B, N, N, R)  0/1 one-hot adjacency (incl. self connections)
    w:     (c_in, R*C)   transposed torch Linear weight
    b:     (1, R*C)      Linear bias
    a:     (R, 2*C)      attention vector
    """
    B, N, c_in = atoms.shape
    R, two_c = a.shape
    C = two_c // 2
    assert w.shape == (c_in, R * C) and b.shape == (1, R * C)
    JN = R * N

    if batch_block is None:
        batch_block = _pick_batch_block(B, N, R, c_in, C)
    assert B % batch_block == 0
    Bt = batch_block

    # --- one-time weight refactoring (would normally live at param-load time) ---
    w3 = w.reshape(c_in, R, C)
    b2 = b.reshape(R, C)
    # Fold the attention halves into the projection (block-diagonal fold, exact).
    wa1 = jnp.einsum("krc,rc->kr", w3, a[:, :C])               # (c_in, R)
    wa2 = jnp.einsum("krc,rc->kr", w3, a[:, C:])               # (c_in, R)
    ba1 = jnp.einsum("rc,rc->r", b2, a[:, :C])                 # (R,)
    ba2 = jnp.einsum("rc,rc->r", b2, a[:, C:])                 # (R,)
    # e1 weight pre-tiled over neighbours in the r-major lane packing q = r*N+j.
    we1 = jnp.repeat(wa1, N, axis=1)                           # (c_in, JN)
    be1 = jnp.repeat(ba1, N)[None, :]                          # (1, JN)
    # Fused projection operand: [e1 lanes | h lanes] -> one MXU push per step.
    w_all = jnp.concatenate([we1, w], axis=1)                  # (c_in, JN + R*C)
    b_all = jnp.concatenate([be1, b], axis=1)                  # (1, JN + R*C)
    # e2 weight: block-diagonal neighbour expansion so e2 comes out lane-dense.
    w2big = jnp.einsum("kr,jm->jkrm", wa2,
                       jnp.eye(N, dtype=wa2.dtype)).reshape(N * c_in, JN)
    be2 = jnp.repeat(ba2, N)[None, :]                          # (1, JN)

    # --- per-call input relayout: lane-dense joint axis, int8 bonds ----------
    # TODO(synk): upstream should ideally emit bonds already as int8 (B,N,R*N)
    # to avoid this extra XLA pass over the largest input.
    bonds_rn = bonds.astype(jnp.int8).transpose(0, 1, 3, 2).reshape(B, N, JN)
    atoms_flat = atoms.reshape(B, 1, N * c_in)                 # contiguous -> free

    kern = functools.partial(gat_kernel, bt=Bt, n_nodes=N, n_rel=R,
                             c_out=C, c_in=c_in)
    return pl.pallas_call(
        kern,
        out_shape=jax.ShapeDtypeStruct((B, N, C), jnp.float32),
        grid=(B // Bt,),
        in_specs=[
            pl.BlockSpec((Bt, N, c_in), lambda i: (i, 0, 0)),
            pl.BlockSpec((Bt, 1, N * c_in), lambda i: (i, 0, 0)),
            pl.BlockSpec((Bt, N, JN), lambda i: (i, 0, 0)),
            pl.BlockSpec((c_in, JN + R * C), lambda i: (0, 0)),
            pl.BlockSpec((1, JN + R * C), lambda i: (0, 0)),
            pl.BlockSpec((N * c_in, JN), lambda i: (0, 0)),
            pl.BlockSpec((1, JN), lambda i: (0, 0)),
        ],
        out_specs=pl.BlockSpec((Bt, N, C), lambda i: (i, 0, 0)),
        compiler_params=pltpu.CompilerParams(
            dimension_semantics=("parallel",),        # batch axis -> v7x megacore
            vmem_limit_bytes=48 << 20),
    )(atoms, atoms_flat, bonds_rn, w_all, b_all, w2big, be2)


# ----------------------------------------------------------------------------
# Pure-JAX reference (mirrors the torch forward, dense-masked form)
# ----------------------------------------------------------------------------
def gat_ref(atoms, bonds, w, b, a):
    B, N, _ = atoms.shape
    R, two_c = a.shape
    C = two_c // 2
    h = atoms @ w + b
    h4 = h.reshape(B, N, R, C)
    e1 = jnp.einsum("bnrc,rc->bnr", h4, a[:, :C])
    e2 = jnp.einsum("bnrc,rc->bnr", h4, a[:, C:])
    logits = _leaky(e1[:, :, None, :] + e2[:, None, :, :])
    logits = jnp.where(bonds > 0.5, logits, -9e15)
    probs = jax.nn.softmax(logits.reshape(B, N, N * R), axis=-1).reshape(B, N, N, R)
    return jnp.einsum("bijr,bjrc->bic", probs, h4)


# ----------------------------------------------------------------------------
if __name__ == "__main__":
    B, N = 2, 8
    c_in, c_out, n_rel = 8, 16, 5

    key = jax.random.PRNGKey(0)
    kw, kb, ka, kat, kbo = jax.random.split(key, 5)

    # xavier_uniform(gain=1.414) on the torch (R*C, c_in) weight, stored transposed.
    wb = 1.414 * (6.0 / (c_in + n_rel * c_out)) ** 0.5
    w = jax.random.uniform(kw, (c_in, n_rel * c_out), jnp.float32, -wb, wb)
    bb = 1.0 / c_in ** 0.5                                    # default Linear bias init
    b = jax.random.uniform(kb, (1, n_rel * c_out), jnp.float32, -bb, bb)
    ab = 1.414 * (6.0 / (n_rel + 2 * c_out)) ** 0.5
    a = jax.random.uniform(ka, (n_rel, 2 * c_out), jnp.float32, -ab, ab)

    # one-hot atom features
    atom_ids = jax.random.randint(kat, (B, N), 0, c_in)
    atoms = jax.nn.one_hot(atom_ids, c_in, dtype=jnp.float32)
    # one-hot bond adjacency: every (i, j) pair (including the diagonal
    # self-connection) gets exactly one relation type, as the module assumes.
    bond_ids = jax.random.randint(kbo, (B, N, N), 0, n_rel)
    bonds = jax.nn.one_hot(bond_ids, n_rel, dtype=jnp.float32)

    out = jax.block_until_ready(gat_layer(atoms, bonds, w, b, a))
    ref = jax.block_until_ready(gat_ref(atoms, bonds, w, b, a))

    assert out.shape == (B, N, c_out), out.shape
    assert jnp.allclose(out, ref, rtol=1e-2, atol=1e-2), (out, ref)
    print("KERNEL_OK")
</pallas_src>

<mosaic_0001>
module attributes {stable_mosaic.version = 11 : i64} {
  func.func @gat_kernel(%arg0: i32, %arg1: memref<1x8x8xf32, #tpu.memory_space<vmem>>, %arg2: memref<1x1x64xf32, #tpu.memory_space<vmem>>, %arg3: memref<1x8x40xi8, #tpu.memory_space<vmem>>, %arg4: memref<8x120xf32, #tpu.memory_space<vmem>>, %arg5: memref<1x120xf32, #tpu.memory_space<vmem>>, %arg6: memref<64x40xf32, #tpu.memory_space<vmem>>, %arg7: memref<1x40xf32, #tpu.memory_space<vmem>>, %arg8: memref<1x8x16xf32, #tpu.memory_space<vmem>>) attributes {dimension_semantics = [#tpu.dimension_semantics<parallel>], iteration_bounds = array<i64: 2>, scalar_prefetch = 0 : i64, scratch_operands = 0 : i64, tpu.core_type = #tpu.core_type<tc>, window_params = [{transform_indices = @transform_0, window_bounds = array<i64: 1, 8, 8>}, {transform_indices = @transform_1, window_bounds = array<i64: 1, 1, 64>}, {transform_indices = @transform_2, window_bounds = array<i64: 1, 8, 40>}, {pipeline_mode = #tpu.pipeline_mode<synchronous>, transform_indices = @transform_3, window_bounds = array<i64: 8, 120>}, {pipeline_mode = #tpu.pipeline_mode<synchronous>, transform_indices = @transform_4, window_bounds = array<i64: 1, 120>}, {pipeline_mode = #tpu.pipeline_mode<synchronous>, transform_indices = @transform_5, window_bounds = array<i64: 64, 40>}, {pipeline_mode = #tpu.pipeline_mode<synchronous>, transform_indices = @transform_6, window_bounds = array<i64: 1, 40>}, {transform_indices = @transform_7, window_bounds = array<i64: 1, 8, 16>}]} {
    %c0 = arith.constant 0 : index
    %c0_0 = arith.constant 0 : index
    %c0_1 = arith.constant 0 : index
    %0 = vector.load %arg1[%c0, %c0_0, %c0_1] : memref<1x8x8xf32, #tpu.memory_space<vmem>>, vector<1x8x8xf32>
    %1 = vector.shape_cast %0 : vector<1x8x8xf32> to vector<8x8xf32>
    %c0_2 = arith.constant 0 : index
    %c0_3 = arith.constant 0 : index
    %2 = vector.load %arg4[%c0_2, %c0_3] : memref<8x120xf32, #tpu.memory_space<vmem>>, vector<8x120xf32>
    %cst = arith.constant dense<0.000000e+00> : vector<8x120xf32>
    %3 = tpu.matmul %1, %2, %cst {dimension_numbers = #tpu.dot_dimension_numbers<[1], [0], [0], [1], [0, 0, 1, 1], [], []>} : vector<8x8xf32>, vector<8x120xf32>, vector<8x120xf32> -> vector<8x120xf32>
    %c0_4 = arith.constant 0 : index
    %c0_5 = arith.constant 0 : index
    %4 = vector.load %arg5[%c0_4, %c0_5] : memref<1x120xf32, #tpu.memory_space<vmem>>, vector<1x120xf32>
    %5 = vector.broadcast %4 : vector<1x120xf32> to vector<8x120xf32>
    %6 = arith.addf %3, %5 : vector<8x120xf32>
    %7 = vector.extract_strided_slice %6 {offsets = [0, 0], sizes = [8, 40], strides = [1, 1]} : vector<8x120xf32> to vector<8x40xf32>
    %8 = vector.shape_cast %7 : vector<8x40xf32> to vector<1x8x40xf32>
    %c0_6 = arith.constant 0 : index
    %c0_7 = arith.constant 0 : index
    %c0_8 = arith.constant 0 : index
    %9 = vector.load %arg2[%c0_6, %c0_7, %c0_8] : memref<1x1x64xf32, #tpu.memory_space<vmem>>, vector<1x1x64xf32>
    %10 = vector.shape_cast %9 : vector<1x1x64xf32> to vector<1x64xf32>
    %c0_9 = arith.constant 0 : index
    %c0_10 = arith.constant 0 : index
    %11 = vector.load %arg6[%c0_9, %c0_10] : memref<64x40xf32, #tpu.memory_space<vmem>>, vector<64x40xf32>
    %cst_11 = arith.constant dense<0.000000e+00> : vector<1x40xf32>
    %12 = tpu.matmul %10, %11, %cst_11 {dimension_numbers = #tpu.dot_dimension_numbers<[1], [0], [0], [1], [0, 0, 1, 1], [], []>} : vector<1x64xf32>, vector<64x40xf32>, vector<1x40xf32> -> vector<1x40xf32>
    %c0_12 = arith.constant 0 : index
    %c0_13 = arith.constant 0 : index
    %13 = vector.load %arg7[%c0_12, %c0_13] : memref<1x40xf32, #tpu.memory_space<vmem>>, vector<1x40xf32>
    %14 = arith.addf %12, %13 : vector<1x40xf32>
    %15 = vector.shape_cast %14 : vector<1x40xf32> to vector<1x1x40xf32>
    %16 = vector.broadcast %15 : vector<1x1x40xf32> to vector<1x8x40xf32>
    %17 = arith.addf %8, %16 : vector<1x8x40xf32>
    %cst_14 = arith.constant 0.000000e+00 : f32
    %18 = vector.broadcast %cst_14 : f32 to vector<1x8x40xf32>
    %19 = arith.cmpf oge, %17, %18 : vector<1x8x40xf32>
    %cst_15 = arith.constant 2.000000e-01 : f32
    %20 = vector.broadcast %cst_15 : f32 to vector<1x8x40xf32>
    %21 = arith.mulf %20, %17 : vector<1x8x40xf32>
    %22 = arith.select %19, %17, %21 : vector<1x8x40xi1>, vector<1x8x40xf32>
    %c0_16 = arith.constant 0 : index
    %c0_17 = arith.constant 0 : index
    %c0_18 = arith.constant 0 : index
    %23 = vector.load %arg3[%c0_16, %c0_17, %c0_18] : memref<1x8x40xi8, #tpu.memory_space<vmem>>, vector<1x8x40xi8>
    %24 = arith.sitofp %23 : vector<1x8x40xi8> to vector<1x8x40xf32>
    %cst_19 = arith.constant dense<0xFF800000> : vector<1x8xf32>
    %25 = vector.multi_reduction <maximumf>, %22, %cst_19 [2] : vector<1x8x40xf32> to vector<1x8xf32>
    %26 = vector.shape_cast %25 : vector<1x8xf32> to vector<1x8x1xf32>
    %27 = vector.broadcast %26 : vector<1x8x1xf32> to vector<1x8x40xf32>
    %28 = arith.subf %22, %27 : vector<1x8x40xf32>
    %29 = math.exp %28 : vector<1x8x40xf32>
    %30 = arith.mulf %24, %29 : vector<1x8x40xf32>
    %cst_20 = arith.constant dense<0.000000e+00> : vector<1x8xf32>
    %31 = vector.multi_reduction <add>, %30, %cst_20 [2] : vector<1x8x40xf32> to vector<1x8xf32>
    %32 = vector.shape_cast %31 : vector<1x8xf32> to vector<1x8x1xf32>
    %33 = tpu.reciprocal %32 {approx = true} : vector<1x8x1xf32> -> vector<1x8x1xf32>
    %34 = vector.broadcast %33 : vector<1x8x1xf32> to vector<1x8x40xf32>
    %35 = arith.mulf %30, %34 : vector<1x8x40xf32>
    %36 = arith.truncf %35 : vector<1x8x40xf32> to vector<1x8x40xbf16>
    %37 = vector.extract_strided_slice %6 {offsets = [0, 40], sizes = [8, 80], strides = [1, 1]} : vector<8x120xf32> to vector<8x80xf32>
    %38 = arith.truncf %37 : vector<8x80xf32> to vector<8x80xbf16>
    %cst_21 = arith.constant 0.000000e+00 : f32
    %39 = vector.broadcast %cst_21 : f32 to vector<1x8x16xf32>
    %40 = vector.extract_strided_slice %36 {offsets = [0, 0, 0], sizes = [1, 8, 8], strides = [1, 1, 1]} : vector<1x8x40xbf16> to vector<1x8x8xbf16>
    %41 = vector.extract_strided_slice %38 {offsets = [0, 0], sizes = [8, 16], strides = [1, 1]} : vector<8x80xbf16> to vector<8x16xbf16>
    %42 = vector.shape_cast %41 : vector<8x16xbf16> to vector<1x8x16xbf16>
    "tpu.trace_start"() <{level = 10 : i32, message = "bij,bjc->bic"}> : () -> ()
    %cst_22 = arith.constant dense<0.000000e+00> : vector<1x8x16xf32>
    %43 = tpu.matmul %40, %42, %cst_22 {dimension_numbers = #tpu.dot_dimension_numbers<[2], [1], [1], [2], [0, 0, 0, 1, 1, 2], [0], [0]>} : vector<1x8x8xbf16>, vector<1x8x16xbf16>, vector<1x8x16xf32> -> vector<1x8x16xf32>
    "tpu.trace_stop"() : () -> ()
    %44 = arith.addf %39, %43 : vector<1x8x16xf32>
    %45 = vector.extract_strided_slice %36 {offsets = [0, 0, 8], sizes = [1, 8, 8], strides = [1, 1, 1]} : vector<1x8x40xbf16> to vector<1x8x8xbf16>
    %46 = vector.extract_strided_slice %38 {offsets = [0, 16], sizes = [8, 16], strides = [1, 1]} : vector<8x80xbf16> to vector<8x16xbf16>
    %47 = vector.shape_cast %46 : vector<8x16xbf16> to vector<1x8x16xbf16>
    "tpu.trace_start"() <{level = 10 : i32, message = "bij,bjc->bic"}> : () -> ()
    %cst_23 = arith.constant dense<0.000000e+00> : vector<1x8x16xf32>
    %48 = tpu.matmul %45, %47, %cst_23 {dimension_numbers = #tpu.dot_dimension_numbers<[2], [1], [1], [2], [0, 0, 0, 1, 1, 2], [0], [0]>} : vector<1x8x8xbf16>, vector<1x8x16xbf16>, vector<1x8x16xf32> -> vector<1x8x16xf32>
    "tpu.trace_stop"() : () -> ()
    %49 = arith.addf %44, %48 : vector<1x8x16xf32>
    %50 = vector.extract_strided_slice %36 {offsets = [0, 0, 16], sizes = [1, 8, 8], strides = [1, 1, 1]} : vector<1x8x40xbf16> to vector<1x8x8xbf16>
    %51 = vector.extract_strided_slice %38 {offsets = [0, 32], sizes = [8, 16], strides = [1, 1]} : vector<8x80xbf16> to vector<8x16xbf16>
    %52 = vector.shape_cast %51 : vector<8x16xbf16> to vector<1x8x16xbf16>
    "tpu.trace_start"() <{level = 10 : i32, message = "bij,bjc->bic"}> : () -> ()
    %cst_24 = arith.constant dense<0.000000e+00> : vector<1x8x16xf32>
    %53 = tpu.matmul %50, %52, %cst_24 {dimension_numbers = #tpu.dot_dimension_numbers<[2], [1], [1], [2], [0, 0, 0, 1, 1, 2], [0], [0]>} : vector<1x8x8xbf16>, vector<1x8x16xbf16>, vector<1x8x16xf32> -> vector<1x8x16xf32>
    "tpu.trace_stop"() : () -> ()
    %54 = arith.addf %49, %53 : vector<1x8x16xf32>
    %55 = vector.extract_strided_slice %36 {offsets = [0, 0, 24], sizes = [1, 8, 8], strides = [1, 1, 1]} : vector<1x8x40xbf16> to vector<1x8x8xbf16>
    %56 = vector.extract_strided_slice %38 {offsets = [0, 48], sizes = [8, 16], strides = [1, 1]} : vector<8x80xbf16> to vector<8x16xbf16>
    %57 = vector.shape_cast %56 : vector<8x16xbf16> to vector<1x8x16xbf16>
    "tpu.trace_start"() <{level = 10 : i32, message = "bij,bjc->bic"}> : () -> ()
    %cst_25 = arith.constant dense<0.000000e+00> : vector<1x8x16xf32>
    %58 = tpu.matmul %55, %57, %cst_25 {dimension_numbers = #tpu.dot_dimension_numbers<[2], [1], [1], [2], [0, 0, 0, 1, 1, 2], [0], [0]>} : vector<1x8x8xbf16>, vector<1x8x16xbf16>, vector<1x8x16xf32> -> vector<1x8x16xf32>
    "tpu.trace_stop"() : () -> ()
    %59 = arith.addf %54, %58 : vector<1x8x16xf32>
    %60 = vector.extract_strided_slice %36 {offsets = [0, 0, 32], sizes = [1, 8, 8], strides = [1, 1, 1]} : vector<1x8x40xbf16> to vector<1x8x8xbf16>
    %61 = vector.extract_strided_slice %38 {offsets = [0, 64], sizes = [8, 16], strides = [1, 1]} : vector<8x80xbf16> to vector<8x16xbf16>
    %62 = vector.shape_cast %61 : vector<8x16xbf16> to vector<1x8x16xbf16>
    "tpu.trace_start"() <{level = 10 : i32, message = "bij,bjc->bic"}> : () -> ()
    %cst_26 = arith.constant dense<0.000000e+00> : vector<1x8x16xf32>
    %63 = tpu.matmul %60, %62, %cst_26 {dimension_numbers = #tpu.dot_dimension_numbers<[2], [1], [1], [2], [0, 0, 0, 1, 1, 2], [0], [0]>} : vector<1x8x8xbf16>, vector<1x8x16xbf16>, vector<1x8x16xf32> -> vector<1x8x16xf32>
    "tpu.trace_stop"() : () -> ()
    %64 = arith.addf %59, %63 : vector<1x8x16xf32>
    %c0_27 = arith.constant 0 : index
    %c0_28 = arith.constant 0 : index
    %c0_29 = arith.constant 0 : index
    %65 = vector.load %arg8[%c0_27, %c0_28, %c0_29] : memref<1x8x16xf32, #tpu.memory_space<vmem>>, vector<1x8x16xf32>
    tpu.vector_store %arg8[%c0_27, %c0_28, %c0_29], %64 {strides = array<i32>} : memref<1x8x16xf32, #tpu.memory_space<vmem>>, vector<1x8x16xf32>,
    return
  }
  func.func @transform_0(%arg0: i32) -> (i32, i32, i32) {
    %c0_i32 = arith.constant 0 : i32
    %c0_i32_0 = arith.constant 0 : i32
    %c0_i32_1 = arith.constant 0 : i32
    return %arg0, %c0_i32, %c0_i32_0 : i32, i32, i32
  }
  func.func @transform_1(%arg0: i32) -> (i32, i32, i32) {
    %c0_i32 = arith.constant 0 : i32
    %c0_i32_0 = arith.constant 0 : i32
    %c0_i32_1 = arith.constant 0 : i32
    return %arg0, %c0_i32, %c0_i32_0 : i32, i32, i32
  }
  func.func @transform_2(%arg0: i32) -> (i32, i32, i32) {
    %c0_i32 = arith.constant 0 : i32
    %c0_i32_0 = arith.constant 0 : i32
    %c0_i32_1 = arith.constant 0 : i32
    return %arg0, %c0_i32, %c0_i32_0 : i32, i32, i32
  }
  func.func @transform_3(%arg0: i32) -> (i32, i32) {
    %c0_i32 = arith.constant 0 : i32
    %c0_i32_0 = arith.constant 0 : i32
    %c0_i32_1 = arith.constant 0 : i32
    return %c0_i32, %c0_i32_0 : i32, i32
  }
  func.func @transform_4(%arg0: i32) -> (i32, i32) {
    %c0_i32 = arith.constant 0 : i32
    %c0_i32_0 = arith.constant 0 : i32
    %c0_i32_1 = arith.constant 0 : i32
    return %c0_i32, %c0_i32_0 : i32, i32
  }
  func.func @transform_5(%arg0: i32) -> (i32, i32) {
    %c0_i32 = arith.constant 0 : i32
    %c0_i32_0 = arith.constant 0 : i32
    %c0_i32_1 = arith.constant 0 : i32
    return %c0_i32, %c0_i32_0 : i32, i32
  }
  func.func @transform_6(%arg0: i32) -> (i32, i32) {
    %c0_i32 = arith.constant 0 : i32
    %c0_i32_0 = arith.constant 0 : i32
    %c0_i32_1 = arith.constant 0 : i32
    return %c0_i32, %c0_i32_0 : i32, i32
  }
  func.func @transform_7(%arg0: i32) -> (i32, i32, i32) {
    %c0_i32 = arith.constant 0 : i32
    %c0_i32_0 = arith.constant 0 : i32
    %c0_i32_1 = arith.constant 0 : i32
    return %arg0, %c0_i32, %c0_i32_0 : i32, i32, i32
  }
}

</mosaic_0001>

<bundles_post_ra>
// kernel: tpu_custom_call.1
= control target key start
LH: loop header
LB: loop body
LE: loop exit
PB: predicated region body
PF: predicated region fallthrough
CT: control target
= control target key end

     0   :  { %12 = vsyncpa [#allocation3], 0  ;;  %s1317_s0 = inlined_call_operand.vmem [shape: f32[2,8,8], index: 0, kind: input, shape index: {}]   ;;  %s1318_s1 = inlined_call_operand.vmem [shape: f32[2,1,64], index: 1, kind: input, shape index: {}]   ;;  %s1319_s2 = inlined_call_operand.vmem [shape: s8[2,8,40], index: 2, kind: input, shape index: {}]   ;;  %s1320_s3 = inlined_call_operand.vmem [shape: f32[8,120], index: 3, kind: input, shape index: {}]   ;;  %s1321_s4 = inlined_call_operand.vmem [shape: f32[1,120], index: 4, kind: input, shape index: {}]   ;;  %s1322_s5 = inlined_call_operand.vmem [shape: f32[64,40], index: 5, kind: input, shape index: {}]   ;;  %s1323_s6 = inlined_call_operand.vmem [shape: f32[1,40], index: 6, kind: input, shape index: {}]   ;;  %s1324_s7 = inlined_call_operand.hbm [shape: f32[2,8,16], index: 7, kind: output, shape index: {}]  }
   0x1   :  { %14 = vsyncpa [#allocation3 + $0x1], 0  ;;  %s1140_s24 = smov 0   ;;  %s1142_s25 = smov 0  }
   0x2   :  { %s1144_s26 = smov 0   ;;  %s1146_s27 = smov 0  }
   0x3 LB: > { %s1161_s28 = sadd.s32 4294967295, %s1085_s27   ;;  %s849_s29 = sadd.s32 4294967294, %s1085_s27   ;;  %s1085_s27 = sphi %s1146_s27, %s1330_s27   ;;  %s1081_s26 = sphi %s1144_s26, %s1329_s26   ;;  %s1077_s25 = sphi %s1142_s25, %s1328_s25   ;;  %s1073_s24 = sphi %s1140_s24, %s1327_s24  }
   0x4   : > { %s1165_s30 = sadd.s32 1, %s1085_s27   ;;  %s189_s8 = sadd.s32 1, %s1081_s26 }
   0x5   : > { %s186_s9 = ssub.s32 %s1085_s27, %s1165_s30  ;;  %p199_p0 = scmp.ne.s32.totalorder %s1081_s26, %s1077_s25 }
   0x6   : > { %p187_p1 = scmp.eq.s32.totalorder %s186_s9, 0  ;;  %p200_p2 = scmp.eq.s32.totalorder %s1161_s28, 1 }
   0x7   : > { %p205_p3 = scmp.ne.s32.totalorder %s1077_s25, %s1073_s24  ;;  %p206_p4 = scmp.eq.s32.totalorder %s849_s29, 1 }
   0x8   : > { %s1176_s10 = scalar_select %p187_p1, %s1081_s26, %s189_s8  }
   0x9   : > { %p1178_p5 = por %p200_p2, %p199_p0  ;;  %p1182_p6 = por %p206_p4, %p205_p3 }
   0xa   : > { %p852_p7 = scmp.ge.s32.totalorder %s1085_s27, 1  ;;  %p256_p8 = scmp.lt.s32.totalorder %s1085_s27, 3 }
   0xc   : > { %p257_p9 = pnand %p852_p7, %p256_p8 }
   0xd   : > { %v307_v0 = vld [vmem:[%s1320_s3] sm:$0xff] (!%p257_p9)  ;;  %p294_p10 = scmp.lt.s32.totalorder (!%p257_p9), %s1161_s28, 1  ;;  %v1087_v1 = vmov (!%p257_p9), 0.0   ;;  %vm1088_vm0 = vmmov (!%p257_p9), 0   ;;  %v391_v3 = vld [vmem:[%s1322_s5 + $0x8] sm:$0xff] (!%p257_p9)  ;;  %v1089_v4 = vmov (!%p257_p9), 0.0|0.0   ;;  %v473_v22 = vlaneseq (!%p257_p9) }
   0xe   : > { %260 = sbr.rel (%p257_p9) target bundleno = 948 (0x3b4), region = 48  ;;  %889 = vmatprep.subr.mxu1 (!%p257_p9), %v1087_v1  ;;  %891 = vmatprep.mubr.msk.f32.mxu1 (!%p257_p9), %vm1088_vm0, %v1087_v1  ;;  %v390_v2 = vld [vmem:[%s1322_s5] sm:$0xff] (!%p257_p9)  ;;  %vm315_vm1 = vcmask (!%p257_p9), 64512   ;;  %v392_v6 = vld [vmem:[%s1322_s5 + $0x10] sm:$0xff] (!%p257_p9)  ;;  %v393_v7 = vld [vmem:[%s1322_s5 + $0x18] sm:$0xff] (!%p257_p9)  ;;  %vm399_vm2 = vcmask (!%p257_p9), 523264  }
   0xf   : > { %890 = vmatpush3.msra.mxu1 (!%p257_p9), %v307_v0  ;;  %919 = vmatprep.subr.bf16.mxu0 (!%p257_p9), %v1087_v1  ;;  %v944_v5 = vpack.c.bf16 (!%p257_p9), %v391_v3, %v390_v2  ;;  %v947_v9 = vpack.c.bf16 (!%p257_p9), %v393_v7, %v392_v6  ;;  %v394_v10 = vld [vmem:[%s1322_s5 + $0x20] sm:$0xff] (!%p257_p9)  ;;  %v395_v11 = vld [vmem:[%s1322_s5 + $0x28] sm:$0xff] (!%p257_p9)  ;;  %v396_v13 = vld [vmem:[%s1322_s5 + $0x30] sm:$0xff] (!%p257_p9)  ;;  %s1090_s14 = smov (!%p257_p9), 88   ;;  %s1091_s15 = smov (!%p257_p9), 56   ;;  %v474_v23 = vshrl.u32 (!%p257_p9), %v473_v22, 7 }
  0x10   : > { %943 = vmatprep.subr.bf16.mxu1 (!%p257_p9), %v1089_v4  ;;  %921 = vmatprep.mubr.msk.bf16.mxu0 (!%p257_p9), %vm1088_vm0, %v1087_v1  ;;  %v950_v12 = vpack.c.bf16 (!%p257_p9), %v395_v11, %v394_v10  ;;  %v397_v14 = vld [vmem:[%s1322_s5 + $0x38] sm:$0xff] (!%p257_p9)  ;;  %v856_v17 = vld [vmem:[%s1321_s4] ss:$0 sm:$0xff] (!%p257_p9)  ;;  %s1092_s16 = smov (!%p257_p9), 40   ;;  %vm484_vm4 = vcmask (!%p257_p9), 326656   ;;  %vm508_vm5 = vcmask (!%p257_p9), 1043456  }
  0x11   : > { %v953_v15 = vpack.c.bf16 (!%p257_p9), %v397_v14, %v396_v13  ;;  %v398_v24 = vld [vmem:[%s1323_s6] sm:$0x1] (!%p257_p9)  ;;  %v475_v25 = vsub.s32 (!%p257_p9), 0, %v474_v23  ;;  %s1096_s9 = smov (!%p257_p9), 24   ;;  %s1097_s13 = smov (!%p257_p9), 120   ;;  %vm753_vm6 = vcmask (!%p257_p9), 130048  }
  0x12   : > { %s865_s17 = sshll.u32 (!%p257_p9), %s1161_s28, 7 }
  0x15   : > { %s1202_s19 = scalar_select %p294_p10, %s1161_s28, 1 }
  0x17   : > { %s854_s20 = sshll.u32 %s1202_s19, 3  ;;  %s300_s8 = scalar_lea.vmem %s1318_s1, %s1202_s19 }
  0x18   : > { %s297_s23 = scalar_lea.vmem %s1317_s0, %s854_s20  ;;  %v389_v16 = vld [vmem:[%s300_s8] sm:$0x1]  ;;  %s1093_s20 = smov 72  }
  0x19   : > { %v306_v8 = vld [vmem:[%s297_s23] sm:$0xff]  ;;  %s855_s21 = sshll.u32 %s1202_s19, 1  ;;  %s1094_s19 = smov 104  }
  0x1a   : > { %892 = vmatmul.mubr.msk.f32.vlgmr.msra.gmra.mrb[0].mxu1 %vm315_vm1, %v306_v8  ;;  %s304_s29 = scalar_lea.vmem %s1319_s2, %s855_s21  ;;  %s1095_s8 = smov 112  }
  0x1b   : > { %945 = vmatpush3.bf16.msra.mxu1 %v944_v5  ;;  %910 = vmatprep.mubr.msk.f32.mxu1 %vm1088_vm0, %v1087_v1  ;;  %v481_v43 = vld [vmem:[%s304_s29] sm:$0x3]  ;;  %s1275_s23 = scalar_lea.hbm %s1324_s7, %s865_s17 }
  0x1c   : > { %946 = vmatprep.subr.bf16.mxu1 %v1089_v4  ;;  %v482_v44 = vunpack.c.0.s8 %v481_v43 }
  0x1e   : > { %v483_v45 = vcvt.s32.f32 %v482_v44 }
  0x1f   : > { %948 = vmatpush3.bf16.msra.mxu1 %v947_v9 }
  0x20   : > { %949 = vmatprep.subr.bf16.mxu1 %v1089_v4 }
  0x23   : > { %951 = vmatpush3.bf16.msra.mxu1 %v950_v12 }
  0x24   : > { %952 = vmatprep.subr.bf16.mxu1 %v1089_v4 }
  0x27   : > { %954 = vmatpush3.bf16.msra.mxu1 %v953_v15 }
  0x28   : > { %913 = vmatprep.subr.bf16.mxu1 %v1087_v1 }
  0x2a   : > { %911 = vmatmul.mubr.msk.f32.vlgmr.msra.gmra.mrb[2].mxu1 %vm399_vm2, %v389_v16 }
  0x2b   : > { %915 = vmatprep.mubr.msk.bf16.mxu1 %vm1088_vm0, %v1087_v1 }
  0xed   : > { %v385_v18 = vpop.f32.mrb[0].mxu1 }
  0xee   : > { %v386_v19 = vadd.f32 %v856_v17, %v385_v18  ;;  %v893_v20 = vpop.f32.mrb[1].mxu1 }
  0xf0   : > { %v498_v21 = vpack.c.bf16 %v386_v19, %v386_v19 }
  0xf2   : > { %552 = vrot.lane.b32.xlu1 %v498_v21, %s1090_s14  ;;  %s1098_s14 = smov 96  }
  0xf6   : > { %602 = vrot.lane.b32.xlu1 %v498_v21, %s1091_s15  ;;  %s291_s15 = sand.u32 1, %s1077_s25  }
  0xf7   : > { %s756_s28 = scalar_lea.sflag [#allocation3], %s291_s15 }
  0xfa   : > { %653 = vrot.lane.b32.xlu1 %v498_v21, %s1092_s16  ;;  %s853_s16 = sshll.u32 %s291_s15, 3 }
  0xfb   : > { %s293_s18 = scalar_lea.vmem [#allocation2], %s853_s16 }
  0xfd   : > { %v469_v26 = vpop.f32.mrb[2].mxu1 }
  0xfe   : > { %v470_v27 = vadd.f32 %v469_v26, %v398_v24  ;;  %v912_v28 = vpop.f32.mrb[3].mxu1  ;;  %503 = vrot.lane.b32.xlu1 %v498_v21, %s1093_s20  ;;  %s769_s20 = sshll.u32 %s293_s18, 4  ;;  %s1277_s20 = int_to_ptr.vmem [resolvable:$true] %s769_s20 }
  0xff   : > { %s1023_s29 = scalar_lea.vmem %s1277_s20, 128 }
 0x100   : > { %v476_v29 = vrot.slane %v470_v27, %v475_v25  ;;  %p1024_p11 = scmp.ne.s32.totalorder %s1277_s20, %s1023_s29 }
 0x102   : > { %v477_v30 = vadd.f32 %v476_v29, %v386_v19  ;;  %p1025_p12 = pnand %p1024_p11, %p1178_p5 }
 0x104   : > { %vm478_vm3 = vcmp.ge.f32.partialorder %v477_v30, 0.0  ;;  %v479_v31 = vmul.f32 0.2, %v477_v30  ;;  %p1026_p13 = pneg %p1025_p12 }
 0x106   : > { %v480_v32 = vsel %vm478_vm3, %v477_v30, %v479_v31 }
 0x107   : > { %v485_v33 = vsel %vm484_vm4, %v480_v32, -inf }
 0x108   : > { %486 = vmax.xlane.f32.xlu0 %v485_v33 }
 0x164   : > { %v553_v34 = vpop.permute.xlu1 %552 }
 0x165   : > { %v558_v35 = vsel %vm508_vm5, %v553_v34, 0 }
 0x166   : > { %920 = vmatpush3.bf16.msra.mxu0 %v558_v35 }
 0x167   : > { %925 = vmatprep.subr.bf16.mxu0 %v1087_v1 }
 0x168   : > { %v603_v36 = vpop.permute.xlu1 %602 }
 0x169   : > { %v608_v53 = vsel %vm508_vm5, %v603_v36, 0 }
 0x16c   : > { %v654_v37 = vpop.permute.xlu1 %653 }
 0x16d   : > { %v659_v56 = vsel %vm508_vm5, %v654_v37, 0 }
 0x170   : > { %v504_v38 = vpop.permute.xlu1 %503 }
 0x171   : > { %v510_v39 = vsel %vm508_vm5, %v504_v38, 0 }
 0x172   : > { %914 = vmatpush3.bf16.msra.mxu1 %v510_v39 }
 0x195   : > { %v487_v40 = vpop.xlane.xlu0 %486 }
 0x196   : > { %v488_v41 = vsub.f32 %v480_v32, %v487_v40 }
 0x198   : > { %v489_v42 = vmul.f32 1.442695, %v488_v41 }
 0x19a   : > { %1019 = vpow2.f32 %v489_v42 }
 0x1a4   : > { %v1020_v46 = vpop.eup %1019 }
 0x1a5   : > { %v491_v47 = vmul.f32 %v1020_v46, %v483_v45 }
 0x1a7   : > { %v492_v48 = vsel %vm484_vm4, %v491_v47, 0.0 }
 0x1a8   : > { %493 = vadd.xlane.f32.xlu0 %v492_v48 }
 0x235   : > { %v494_v49 = vpop.xlane.xlu0 %493 }
 0x236   : > { %1021 = vrcp.f32 %v494_v49 }
 0x240   : > { %v1022_v50 = vpop.eup %1021 }
 0x241   : > { %v496_v51 = vmul.f32 %v1022_v50, %v491_v47 }
 0x243   : > { %v497_v52 = vpack.c.bf16 %v496_v51, %v496_v51 }
 0x245   : > { %651 = vrot.lane.b32.xlu1 %v497_v52, %s1094_s19  ;;  %600 = vrot.lane.b32.xlu0 %v497_v52, %s1095_s8  ;;  %s1099_s19 = smov [#allocation2]  }
 0x246   : > { %922 = vmatmul.mubr.msk.bf16.vlgmr.msra.gmra.mrb[0].mxu0 %vm315_vm1, %v497_v52  ;;  %s1027_s8 = sshll.u32 %s1099_s19, 4  ;;  %s1028_s8 = int_to_ptr.vmem [resolvable:$false] %s1027_s8 }
 0x247   : > { %926 = vmatpush3.bf16.msra.mxu0 %v608_v53  ;;  %927 = vmatprep.mubr.msk.bf16.mxu0 %vm1088_vm0, %v1087_v1  ;;  %p1030_p0 = scmp.lt.s32.totalorder %s1277_s20, %s1028_s8 }
 0x248   : > { %931 = vmatprep.subr.bf16.mxu0 %v1087_v1 }
 0x249   : > { %704 = vrot.lane.b32.xlu1 %v498_v21, %s1096_s9  ;;  %s1029_s9 = scalar_lea.vmem %s1028_s8, 256 }
 0x24a   : > { %p1031_p1 = scmp.lt.s32.totalorder %s1029_s9, %s1023_s29 }
 0x24c   : > { %p1032_p2 = por %p1031_p1, %p1030_p0 }
 0x24d   : > { %500 = vrot.lane.b32.xlu1 %v497_v52, %s1097_s13 }
 0x24e   : > { %p1033_p3 = pnand %p1032_p2, %p1026_p13 }
 0x251   : > { %702 = vrot.lane.b32.xlu1 %v497_v52, %s1098_s14 }
 0x2b7   : > { %v652_v54 = vpop.permute.xlu1 %651  ;;  %v601_v55 = vpop.permute.xlu0 %600 }
 0x2b8   : > { %928 = vmatmul.mubr.msk.bf16.vlgmr.msra.gmra.mrb[0].mxu0 %vm315_vm1, %v601_v55 }
 0x2b9   : > { %932 = vmatpush3.bf16.msra.mxu0 %v659_v56  ;;  %933 = vmatprep.mubr.msk.bf16.mxu0 %vm1088_vm0, %v1087_v1 }
 0x2ba   : > { %937 = vmatprep.subr.bf16.mxu0 %v1087_v1 }
 0x2bb   : > { %v705_v57 = vpop.permute.xlu1 %704 }
 0x2bc   : > { %v710_v59 = vsel %vm508_vm5, %v705_v57, 0 }
 0x2bf   : > { %v501_v58 = vpop.permute.xlu1 %500 }
 0x2c0   : > { %916 = vmatmul.mubr.msk.bf16.vlgmr.msra.gmra.mrb[4].mxu1 %vm315_vm1, %v501_v58 }
 0x2c3   : > { %v703_v60 = vpop.permute.xlu1 %702 }
 0x2c4   : > { %934 = vmatmul.mubr.msk.bf16.vlgmr.msra.gmra.mrb[0].mxu0 %vm315_vm1, %v652_v54 }
 0x2c5   : > { %938 = vmatpush3.bf16.msra.mxu0 %v710_v59  ;;  %939 = vmatprep.mubr.msk.bf16.mxu0 %vm1088_vm0, %v1087_v1 }
 0x2d0   : > { %940 = vmatmul.mubr.msk.bf16.vlgmr.msra.gmra.mrb[0].mxu0 %vm315_vm1, %v703_v60 }
 0x393   : > { %v546_v61 = vpop.f32.mrb[4].mxu1 }
 0x394   : > { %v917_v62 = vpop.f32.mrb[5].mxu1 }
 0x395   : > { %v549_v63 = vpop.f32.mrb[6].mxu1 }
 0x396   : > { %v918_v0 = vpop.f32.mrb[7].mxu1 }
 0x3a3   : > { %v746_v2 = vpop.f32.mrb[0].mxu0 }
 0x3a4   : > { %v955_v3 = vadd.f32 %v746_v2, %v546_v61  ;;  %v941_v4 = vpop.f32.mrb[1].mxu0 }
 0x3a5   : > { %v749_v1 = vpop.f32.mrb[2].mxu0 }
 0x3a6   : > { %v942_v5 = vpop.f32.mrb[3].mxu0  ;;  %754 = vst.msk [vmem:[%s293_s18] sm:$0xff] %vm753_vm6, %v955_v3 }
 0x3a7   : > { %1036 = shalt.err (!%p1033_p3)
}
 0x3a8   : > { %s1037_s13 = scalar_lea.hbm %s1275_s23, 128  ;;  %s1041_s16 = scalar_lea.hbm %s1324_s7, 256 }
 0x3a9   : > { %p1038_p4 = scmp.ne.s32.totalorder %s1275_s23, %s1037_s13  ;;  %p1042_p9 = scmp.lt.u32.totalorder %s1275_s23, %s1324_s7 }
 0x3aa   : > { %p1043_p10 = scmp.lt.u32.totalorder %s1041_s16, %s1037_s13  ;;  %p1045_p12 = scmp.lt.u32.totalorder %s1037_s13, %s1275_s23 }
 0x3ab   : > { %p1039_p7 = pnand %p1038_p4, %p1178_p5 }
 0x3ac   : > { %p1044_p11 = por %p1043_p10, %p1042_p9 }
 0x3ad   : > { %p1040_p8 = pneg %p1039_p7 }
 0x3ae   : > { %p1046_p13 = por %p1045_p12, %p1044_p11 }
 0x3b0   : > { %p1047_p0 = pnand %p1046_p13, %p1040_p8 }
 0x3b2   : > { %1050 = shalt.err (!%p1047_p0)
}
 0x3b3   : > { %968 = dma.vmem_to_hbm [thread:$0]  (%p1178_p5), %s1277_s20, 128, %s1275_s23, %s756_s28  }
 0x3b4 PF: > { %p974_p1 = scmp.ge.s32.totalorder %s1085_s27, 2  ;;  %s781_s21 = sand.u32 1, %s1073_s24  }
 0x3b5   : > { %s782_s22 = scalar_lea.sflag [#allocation3], %s781_s21 }
 0x3b6   : > { %p971_p2 = pnand %p974_p1, %p1182_p6 }
 0x3b8   : > { %1068 = dma.done.wait (!%p971_p2), %s782_s22, 128  }
 0x3b9   : > { %1070 = vsyncadd (!%p971_p2), %s782_s22, 4294967168  ;;  %p17_p3 = scmp.ge.s32.totalorder %s1165_s30, 4   ;;  %s1327_s24 = smov %s1077_s25 }
 0x3ba   : > { %s1328_s25 = smov %s1081_s26  ;;  %s1329_s26 = smov %s1176_s10 }
 0x3bb   : > { %s1330_s27 = smov %s1165_s30  ;;  %19 = sbr.rel (!%p17_p3) target bundleno = 3 (0x3), region = 89 }
 0x3c2   :  { %787 = vsyncpa [#allocation3], 1 }
 0x3c3   :  { %789 = vsyncpa [#allocation3 + $0x1], 1 }

</bundles_post_ra>
